<compile_context>
chip_gen: v7x
topology: tpu7x:2x2x1
jax: 0.10.0
libtpu: 0.0.40
codegen_flags: <defaults>
</compile_context>

<pallas_src>
import jax
import jax.numpy as jnp
from jax.experimental import pallas as pl
from jax.experimental.pallas import tpu as pltpu

_LANE = 128
_SUB = 8


def _round_up(x, m):
    return ((x + m - 1) // m) * m


def _rgcn_post_kernel(h_ref, w_ref, b_ref, o_ref):
    # h_ref: (TR, Dp) lane-dense node-feature tile (P node rows packed per lane-row)
    # w_ref: (Dp, Dp) (block-diagonally replicated) linear weight, [in, out] layout
    # b_ref: (1, Dp)  fused bias (bias @ W + b_lin), replicated per packed group
    y = jnp.dot(h_ref[...], w_ref[...], preferred_element_type=jnp.float32)  # MXU
    y = y + b_ref[...]                                                        # VPU
    o_ref[...] = jnp.maximum(y, 0.0).astype(o_ref.dtype)                     # ReLU


def prepare_rgcn_params(bias, w, b_lin, *, param_dtype=None):
    """Once-per-layer packing of the RGCN linear parameters.

    bias:  [D]    RGCN per-feature bias
    w:     [D, D] Linear weight in [in, out] layout (torch weight.T)
    b_lin: [D]    Linear bias

    Fuses the bias:  (h + bias) @ W + b_lin == h @ W + (bias @ W + b_lin)
    and, when D divides the 128-lane width, builds a block-diagonal weight so
    P = 128 // D node rows can be packed into one lane-dense vreg row.
    """
    D = w.shape[0]
    if param_dtype is None:
        param_dtype = w.dtype
    bias_fused = (bias.astype(jnp.float32) @ w.astype(jnp.float32)
                  + b_lin.astype(jnp.float32))

    if D < _LANE and _LANE % D == 0:
        # Lane-dense packing: P independent copies of W on the block diagonal.
        P, Dp = _LANE // D, _LANE
        w_k = jnp.kron(jnp.eye(P, dtype=w.dtype), w)
        b_k = jnp.tile(bias_fused, P)
    else:
        # D already a lane multiple, or doesn't divide 128: keep D as-is
        # (blocks whose last dim equals the full array dim are always legal).
        P, Dp = 1, D
        w_k, b_k = w, bias_fused

    return {
        "w_k": w_k.astype(param_dtype),
        "b_k": b_k.reshape(1, Dp).astype(jnp.float32),
        "P": P,
        "D": D,
        "Dp": Dp,
    }


def rgcn_layer_forward(h, params, *, max_tile_rows=2048,
                       small_n_elems=1 << 16, allow_jnp_fallback=True):
    """relu((h + bias) @ W + b_lin) — the RGCNLayer post-propagation update.

    h:      [N, D] node representations (output of propagate/aggregator)
    params: result of prepare_rgcn_params (hoisted out of the forward path)
    """
    N, D = h.shape
    assert D == params["D"], "feature dim mismatch with prepared params"
    P, Dp = params["P"], params["Dp"]
    w_k, b_k = params["w_k"], params["b_k"]
    out_dtype = h.dtype

    # Tiny graphs: fixed launch + DMA setup cost exceeds the ~MFLOPs of work;
    # fused XLA is as fast or faster, so skip the kernel.
    if allow_jnp_fallback and N * D < small_n_elems:
        w0 = w_k[:D, :D].astype(jnp.float32)
        b0 = b_k[0, :D]
        y = h.astype(jnp.float32) @ w0 + b0
        return jnp.maximum(y, 0.0).astype(out_dtype)

    # --- choose layout (no padded copies of h, ever) -------------------------
    if P > 1 and N % P == 0:
        rows, dp = N // P, Dp
        hp = h.reshape(rows, dp)          # free row-major repack into lanes
        w_eff, b_eff = w_k, b_k
        packed = True
    else:
        # Unpacked: last block dim equals the full array dim D (legal per the
        # (8,128) rule); masked stores, but zero extra HBM bytes / copies.
        rows, dp = N, D
        hp = h
        w_eff = w_k if w_k.shape[0] == D else w_k[:D, :D]
        b_eff = b_k if b_k.shape[1] == D else b_k[:, :D]
        packed = False

    # --- row tiling -----------------------------------------------------------
    # Big tiles (1 MiB f32 at 2048x128) amortize the ~0.35 us/grid-step cost,
    # but keep >= 2 grid steps when possible so both v7x TensorCores get work
    # (the axis is marked "parallel").  tile_rows is always a multiple of 8.
    tile_rows = min(max_tile_rows,
                    max(_SUB, _round_up(pl.cdiv(rows, 2), _SUB)))
    grid_m = pl.cdiv(rows, tile_rows)     # partial last block handled by Pallas

    itemsize = jnp.dtype(out_dtype).itemsize
    cost = pl.CostEstimate(
        flops=2 * rows * dp * dp,
        transcendentals=0,
        bytes_accessed=(2 * rows * dp + dp * dp) * itemsize,
    )

    out = pl.pallas_call(
        _rgcn_post_kernel,
        out_shape=jax.ShapeDtypeStruct((rows, dp), out_dtype),
        grid_spec=pltpu.PrefetchScalarGridSpec(
            num_scalar_prefetch=0,
            grid=(grid_m,),
            in_specs=[
                pl.BlockSpec((tile_rows, dp), lambda i: (i, 0)),  # node tile
                pl.BlockSpec((dp, dp), lambda i: (0, 0)),         # constant weight
                pl.BlockSpec((1, dp), lambda i: (0, 0)),          # constant fused bias
            ],
            out_specs=pl.BlockSpec((tile_rows, dp), lambda i: (i, 0)),
        ),
        compiler_params=pltpu.CompilerParams(
            dimension_semantics=("parallel",)),
        cost_estimate=cost,
    )(hp, w_eff, b_eff)

    if packed:
        out = out.reshape(N, D)           # free row-major unpack
    return out


def rgcn_layer_reference(h, bias, w, b_lin):
    """Pure-JAX reference of the same forward semantics."""
    x = h + bias[None, :]
    y = x @ w + b_lin[None, :]
    return jnp.maximum(y, 0.0)


if __name__ == "__main__":
    # Small shapes consistent with the module: N nodes with out_dim features.
    N, out_dim = 300, 32
    key = jax.random.PRNGKey(0)
    k_h, k_b, k_w, k_bl = jax.random.split(key, 4)

    # Synthetic parameters matching __init__:
    #   self.bias : Parameter(out_dim)
    #   self.line : nn.Linear(out_dim, out_dim) -> weight [out, in], bias [out]
    # Weight stored transposed ([in, out]) for the kernel's x @ W layout.
    h = jax.random.normal(k_h, (N, out_dim), dtype=jnp.float32)
    bias = jax.random.normal(k_b, (out_dim,), dtype=jnp.float32) * 0.1
    w = jax.random.normal(k_w, (out_dim, out_dim), dtype=jnp.float32) * 0.1
    b_lin = jax.random.normal(k_bl, (out_dim,), dtype=jnp.float32) * 0.1

    # TODO(synk): propagate() (DGL graph message passing / aggregator), the
    # forward-unused BatchNorm, and dropout (identity at eval) are not part of
    # this kernel; h above stands in for g.ndata['h'] produced by propagate.

    params = prepare_rgcn_params(bias, w, b_lin)   # hoisted: once per layer

    # Packed lane-dense path (N % 4 == 0).  Fallback disabled so the Pallas
    # kernel itself runs even at this small demo size.
    out = rgcn_layer_forward(h, params, allow_jnp_fallback=False)
    out = jax.block_until_ready(out)
    ref = rgcn_layer_reference(h, bias, w, b_lin)
    assert out.shape == ref.shape, "shape mismatch vs reference"
    assert jnp.allclose(out, ref, atol=1e-4, rtol=1e-4), "mismatch vs reference"

    # Ragged node count (N % 4 != 0) exercises the unpacked, copy-free path.
    h2 = h[: N - 3]
    out2 = jax.block_until_ready(
        rgcn_layer_forward(h2, params, allow_jnp_fallback=False))
    ref2 = rgcn_layer_reference(h2, bias, w, b_lin)
    assert jnp.allclose(out2, ref2, atol=1e-4, rtol=1e-4), "ragged-N mismatch"

    print("KERNEL_OK")
</pallas_src>

<mosaic_0001>
module attributes {stable_mosaic.version = 11 : i64} {
  func.func @_rgcn_post_kernel(%arg0: i32, %arg1: memref<40x128xf32, #tpu.memory_space<vmem>>, %arg2: memref<128x128xf32, #tpu.memory_space<vmem>>, %arg3: memref<1x128xf32, #tpu.memory_space<vmem>>, %arg4: memref<40x128xf32, #tpu.memory_space<vmem>>) attributes {dimension_semantics = [#tpu.dimension_semantics<parallel>], iteration_bounds = array<i64: 2>, scalar_prefetch = 0 : i64, scratch_operands = 0 : i64, tpu.core_type = #tpu.core_type<tc>, window_params = [{transform_indices = @transform_0, window_bounds = array<i64: 40, 128>}, {pipeline_mode = #tpu.pipeline_mode<synchronous>, transform_indices = @transform_1, window_bounds = array<i64: 128, 128>}, {pipeline_mode = #tpu.pipeline_mode<synchronous>, transform_indices = @transform_2, window_bounds = array<i64: 1, 128>}, {transform_indices = @transform_3, window_bounds = array<i64: 40, 128>}]} {
    %c0 = arith.constant 0 : index
    %c0_0 = arith.constant 0 : index
    %0 = vector.load %arg1[%c0, %c0_0] : memref<40x128xf32, #tpu.memory_space<vmem>>, vector<40x128xf32>
    %c0_1 = arith.constant 0 : index
    %c0_2 = arith.constant 0 : index
    %1 = vector.load %arg2[%c0_1, %c0_2] : memref<128x128xf32, #tpu.memory_space<vmem>>, vector<128x128xf32>
    %cst = arith.constant dense<0.000000e+00> : vector<40x128xf32>
    %2 = tpu.matmul %0, %1, %cst {dimension_numbers = #tpu.dot_dimension_numbers<[1], [0], [0], [1], [0, 0, 1, 1], [], []>} : vector<40x128xf32>, vector<128x128xf32>, vector<40x128xf32> -> vector<40x128xf32>
    %c0_3 = arith.constant 0 : index
    %c0_4 = arith.constant 0 : index
    %3 = vector.load %arg3[%c0_3, %c0_4] : memref<1x128xf32, #tpu.memory_space<vmem>>, vector<1x128xf32>
    %4 = vector.broadcast %3 : vector<1x128xf32> to vector<40x128xf32>
    %5 = arith.addf %2, %4 : vector<40x128xf32>
    %cst_5 = arith.constant 0.000000e+00 : f32
    %6 = vector.broadcast %cst_5 : f32 to vector<40x128xf32>
    %7 = arith.maximumf %5, %6 : vector<40x128xf32>
    %c0_6 = arith.constant 0 : index
    %c0_7 = arith.constant 0 : index
    %8 = vector.load %arg4[%c0_6, %c0_7] : memref<40x128xf32, #tpu.memory_space<vmem>>, vector<40x128xf32>
    tpu.vector_store %arg4[%c0_6, %c0_7], %7 {strides = array<i32>} : memref<40x128xf32, #tpu.memory_space<vmem>>, vector<40x128xf32>,
    return
  }
  func.func @transform_0(%arg0: i32) -> (i32, i32) {
    %c0_i32 = arith.constant 0 : i32
    %c0_i32_0 = arith.constant 0 : i32
    return %arg0, %c0_i32 : i32, i32
  }
  func.func @transform_1(%arg0: i32) -> (i32, i32) {
    %c0_i32 = arith.constant 0 : i32
    %c0_i32_0 = arith.constant 0 : i32
    %c0_i32_1 = arith.constant 0 : i32
    return %c0_i32, %c0_i32_0 : i32, i32
  }
  func.func @transform_2(%arg0: i32) -> (i32, i32) {
    %c0_i32 = arith.constant 0 : i32
    %c0_i32_0 = arith.constant 0 : i32
    %c0_i32_1 = arith.constant 0 : i32
    return %c0_i32, %c0_i32_0 : i32, i32
  }
  func.func @transform_3(%arg0: i32) -> (i32, i32) {
    %c0_i32 = arith.constant 0 : i32
    %c0_i32_0 = arith.constant 0 : i32
    return %arg0, %c0_i32 : i32, i32
  }
}

</mosaic_0001>

<bundles_post_ra>
// kernel: tpu_custom_call.1
= control target key start
LH: loop header
LB: loop body
LE: loop exit
PB: predicated region body
PF: predicated region fallthrough
CT: control target
= control target key end

     0   :  { %8 = vsyncpa [#allocation3], 0  ;;  %s1009_s0 = inlined_call_operand.hbm [shape: f32[75,128], index: 0, kind: input, shape index: {}]   ;;  %s1010_s1 = inlined_call_operand.hbm [shape: f32[128,128], index: 1, kind: input, shape index: {}]   ;;  %s1011_s2 = inlined_call_operand.vmem [shape: f32[1,128], index: 2, kind: input, shape index: {}]   ;;  %s1012_s3 = inlined_call_operand.hbm [shape: f32[75,128], index: 3, kind: output, shape index: {}]  }
   0x1   :  { %10 = vsyncpa [#allocation3 + $0x1], 0 }
   0x2   :  { %11 = vsyncpa [#allocation6], 0 }
   0x3   :  { %12 = vsyncpa [#allocation4], 0 }
   0x4   :  { %14 = vsyncpa [#allocation4 + $0x1], 0  ;;  %s778_s12 = smov 0   ;;  %s780_s13 = smov 0  }
   0x5   :  { %s782_s14 = smov 0   ;;  %s784_s15 = smov 0  }
   0x6 LB: > { %s799_s16 = sadd.s32 4294967295, %s746_s15   ;;  %s431_s17 = sadd.s32 4294967294, %s746_s15   ;;  %s746_s15 = sphi %s784_s15, %s1032_s15   ;;  %s742_s14 = sphi %s782_s14, %s1031_s14   ;;  %s738_s13 = sphi %s780_s13, %s1030_s13   ;;  %s734_s12 = sphi %s778_s12, %s1029_s12  }
   0x7   : > { %p40_p0 = scmp.ne.s32.totalorder %s738_s13, %s734_s12  ;;  %p1013_p1 = scmp.eq.s32.totalorder %s799_s16, 0 }
   0x8   : > { %p112_p3 = scmp.eq.s32.totalorder %s431_s17, 1  ;;  %p432_p5 = scmp.ge.s32.totalorder %s746_s15, 1 }
   0x9   : > { %p808_p4 = por %p1013_p1, %p40_p0  ;;  %p119_p7 = scmp.lt.s32.totalorder %s746_s15, 3 }
   0xa   : > { %p813_p6 = por %p112_p3, %p40_p0  ;;  %s748_s21 = smov [#allocation5]  }
   0xb   : > { %s1016_s18 = scalar_select %p808_p4, 1, 0 }
   0xc   : > { %s1017_s19 = scalar_select %p813_p6, 1, 0 }
   0xd   : > { %p818_p8 = pnand %p432_p5, %p119_p7  ;;  %s131_s22 = sshll.u32 %s748_s21, 4  ;;  %s822_s22 = int_to_ptr.vmem [resolvable:$true] %s131_s22 }
   0xe   : > { %s834_s24 = sadd.s32 1, %s746_s15   ;;  %s27_s25 = sadd.s32 1, %s742_s14 }
   0xf   : > { %s1018_s20 = scalar_select %p818_p8, 1, 0 }
  0x10   : > { %p562_p9 = pneg %p818_p8  ;;  %s24_s26 = ssub.s32 %s746_s15, %s834_s24 }
  0x11   : > { %s618_s29 = scalar_lea.hbm %s1010_s1, 2048 }
  0x12   : > { %p829_p11 = pnand %p562_p9, %p1013_p1  ;;  %p619_p12 = scmp.ne.s32.totalorder %s1010_s1, %s618_s29 }
  0x13   : > { %p625_p5 = scmp.lt.u32.totalorder %s618_s29, %s1010_s1 }
  0x14   : > { %p620_p13 = pneg %p829_p11 }
  0x16   : > { %p621_p0 = pnand %p620_p13, %p619_p12 }
  0x18   : > { %p622_p3 = pneg %p621_p0 }
  0x1a   : > { %p627_p7 = pnand %p625_p5, %p622_p3 }
  0x1c   : > { %630 = shalt.err (!%p627_p7)
}
  0x1d   : > { %s631_s7 = scalar_lea.vmem %s822_s22, 2048  ;;  %p639_p2 = scmp.lt.s32.totalorder %s822_s22, %s822_s22 }
  0x1e   : > { %p632_p9 = scmp.ne.s32.totalorder %s822_s22, %s631_s7  ;;  %p640_p6 = scmp.lt.s32.totalorder %s631_s7, %s631_s7 }
  0x20   : > { %p634_p10 = pnand %p632_p9, %p620_p13  ;;  %p641_p4 = por %p640_p6, %p639_p2 }
  0x22   : > { %p635_p1 = pneg %p634_p10 }
  0x24   : > { %p642_p8 = pnand %p641_p4, %p635_p1 }
  0x26   : > { %645 = shalt.err (!%p642_p8)
}
  0x27   : > { %s749_s8 = smov 128   ;;  %s750_s9 = smov 8  }
  0x28   : > { %565 = dma.hbm_to_vmem [thread:$0]  (!%p829_p11), %s1010_s1, 2048, %s822_s22, [#allocation6], %s749_s8, %s749_s8, %s750_s9  }
  0x29   : > { %p25_p1 = scmp.eq.s32.totalorder %s24_s26, 0  ;;  %p34_p2 = scmp.ne.s32.totalorder %s742_s14, %s738_s13 }
  0x2a   : > { %p35_p4 = scmp.eq.s32.totalorder %s746_s15, 0  ;;  %p575_p6 = scmp.lt.s32.totalorder %s746_s15, 2 }
  0x2b   : > { %s868_s17 = scalar_select %p25_p1, %s742_s14, %s27_s25  }
  0x2c   : > { %p36_p8 = por %p35_p4, %p34_p2  ;;  %p1020_p10 = scmp.eq.s32.totalorder %s799_s16, 1 }
  0x2d   : > { %s148_s23 = sand.u32 1, %s742_s14   ;;  %s442_s27 = smul.u32 640, %s746_s15 }
  0x2e   : > { %p872_p12 = por %p1020_p10, %p34_p2  ;;  %s552_s28 = smul.u32 40, %s148_s23 }
  0x2f   : > { %p878_p13 = pnand %p575_p6, %p36_p8  ;;  %s885_s25 = scalar_lea.hbm %s1009_s0, %s442_s27 }
  0x30   : > { %s152_s30 = scalar_lea.vmem [#allocation2], %s552_s28  ;;  %s889_s5 = scalar_lea.sflag [#allocation3], %s148_s23 }
  0x31   : > { %s159_s4 = sshll.u32 %s152_s30, 4  ;;  %s646_s6 = scalar_lea.hbm %s885_s25, 640  ;;  %s887_s4 = int_to_ptr.vmem [resolvable:$true] %s159_s4 }
  0x32   : > { %p647_p11 = scmp.ne.s32.totalorder %s885_s25, %s646_s6  ;;  %p648_p0 = pneg %p878_p13 }
  0x33   : > { %s651_s11 = scalar_lea.hbm %s1009_s0, 1280  ;;  %p652_p7 = scmp.lt.u32.totalorder %s885_s25, %s1009_s0 }
  0x34   : > { %p649_p3 = pnand %p648_p0, %p647_p11  ;;  %p653_p9 = scmp.lt.u32.totalorder %s651_s11, %s646_s6 }
  0x35   : > { %p655_p2 = scmp.lt.u32.totalorder %s646_s6, %s885_s25 }
  0x36   : > { %p650_p5 = pneg %p649_p3  ;;  %p654_p1 = por %p653_p9, %p652_p7 }
  0x38   : > { %p656_p4 = por %p655_p2, %p654_p1 }
  0x3a   : > { %p657_p6 = pnand %p656_p4, %p650_p5 }
  0x3c   : > { %660 = shalt.err (!%p657_p6)
}
  0x3d   : > { %s661_s23 = scalar_lea.vmem %s887_s4, 640  ;;  %s751_s28 = smov [#allocation2]  }
  0x3e   : > { %p662_p8 = scmp.ne.s32.totalorder %s887_s4, %s661_s23  ;;  %s666_s26 = sshll.u32 %s751_s28, 4  ;;  %s667_s26 = int_to_ptr.vmem [resolvable:$false] %s666_s26 }
  0x3f   : > { %s668_s30 = scalar_lea.vmem %s667_s26, 1280  ;;  %p669_p3 = scmp.lt.s32.totalorder %s887_s4, %s667_s26 }
  0x40   : > { %p664_p10 = pnand %p662_p8, %p648_p0  ;;  %p670_p7 = scmp.lt.s32.totalorder %s668_s30, %s661_s23 }
  0x42   : > { %p665_p11 = pneg %p664_p10  ;;  %p671_p9 = por %p670_p7, %p669_p3 }
  0x44   : > { %p672_p1 = pnand %p671_p9, %p665_p11 }
  0x46   : > { %675 = shalt.err (!%p672_p1)
}
  0x47   : > { %569 = dma.hbm_to_vmem [thread:$0]  (!%p878_p13), %s885_s25, 640, %s887_s4, %s889_s5, %s749_s8, %s749_s8, %s750_s9  }
  0x48   : > { %p1023_p0 = scmp.ne.s32.totalorder %s1018_s20, 0 }
  0x49   : > { %s923_s6 = sand.u32 (!%p1023_p0), 1, %s738_s13   ;;  %p1024_p5 = scmp.ne.s32.totalorder (!%p1023_p0), %s1016_s18, 0 }
  0x4a   : > { %171 = sbr.rel (%p1023_p0) target bundleno = 358 (0x166), region = 32  ;;  %s174_s10 = scalar_lea.sflag (!%p1023_p0), [#allocation3], %s923_s6 }
  0x4b   : > { %s553_s7 = smul.u32 (!%p1023_p0), 40, %s923_s6 }
  0x4d   : > { %s929_s29 = scalar_lea.vmem (!%p1023_p0), [#allocation2], %s553_s7 }
  0x51   : > { %721 = dma.done.wait (%p1024_p5), %s174_s10, 640  }
  0x52   : > { %723 = vsyncadd (%p1024_p5), %s174_s10, 4294966656  ;;  %p1025_p13 = scmp.eq.s32.totalorder %s799_s16, 0 }
  0x54   : > { %725 = dma.done.wait (%p1025_p13), [#allocation6], 2048   ;;  %p1026_p2 = pmov %p1025_p13 }
  0x55   : > { %v752_v0 = vmov 0.0|0.0   ;;  %vm753_vm0 = vmmov 0   ;;  %v754_v1 = vmov 0.0   ;;  %v211_v2 = vld [vmem:[#allocation5] sm:$0xff]  ;;  %v212_v3 = vld [vmem:[#allocation5 + $0x8] sm:$0xff]  ;;  %v213_v4 = vld [vmem:[#allocation5 + $0x10] sm:$0xff] }
  0x56   : > { %727 = vsyncadd (%p1026_p2), [#allocation6], 4294965248  ;;  %512 = vmatprep.subr.bf16.mxu0 %v752_v0  ;;  %536 = vmatprep.subr.bf16.mxu1 %v752_v0  ;;  %v513_v5 = vpack.c.bf16 %v212_v3, %v211_v2  ;;  %v214_v6 = vld [vmem:[#allocation5 + $0x18] sm:$0xff]  ;;  %v215_v8 = vld [vmem:[#allocation5 + $0x20] sm:$0xff]  ;;  %s203_s8 = scalar_lea.vmem [#allocation7], %s553_s7  ;;  %s443_s25 = smul.u32 640, %s799_s16 }
  0x57   : > { %497 = vmatprep.mubr.msk.f32.mxu0 %vm753_vm0, %v754_v1  ;;  %506 = vmatprep.mubr.msk.f32.mxu1 %vm753_vm0, %v754_v1  ;;  %v516_v7 = vpack.c.bf16 %v214_v6, %v213_v4  ;;  %v216_v9 = vld [vmem:[#allocation5 + $0x28] sm:$0xff]  ;;  %v217_v11 = vld [vmem:[#allocation5 + $0x30] sm:$0xff]  ;;  %v218_v12 = vld [vmem:[#allocation5 + $0x38] sm:$0xff]  ;;  %s348_s9 = sshll.u32 %s203_s8, 4  ;;  %s335_s16 = scalar_lea.sflag [#allocation4], %s923_s6  ;;  %s960_s9 = int_to_ptr.vmem [resolvable:$true] %s348_s9 }
  0x58   : > { %514 = vmatpush3.bf16.msra.mxu0 %v513_v5  ;;  %544 = vmatpush3.bf16.msra.mxu1 %v513_v5  ;;  %v519_v10 = vpack.c.bf16 %v216_v9, %v215_v8  ;;  %v522_v13 = vpack.c.bf16 %v218_v12, %v217_v11  ;;  %v219_v14 = vld [vmem:[#allocation5 + $0x40] sm:$0xff]  ;;  %v220_v15 = vld [vmem:[#allocation5 + $0x48] sm:$0xff]  ;;  %v221_v17 = vld [vmem:[#allocation5 + $0x50] sm:$0xff]  ;;  %s965_s11 = scalar_lea.hbm %s1012_s3, %s443_s25  ;;  %s676_s27 = scalar_lea.vmem %s960_s9, 640 }
  0x59   : > { %515 = vmatprep.subr.bf16.mxu0 %v752_v0  ;;  %537 = vmatprep.subr.bf16.mxu1 %v752_v0  ;;  %v525_v16 = vpack.c.bf16 %v220_v15, %v219_v14  ;;  %v222_v18 = vld [vmem:[#allocation5 + $0x58] sm:$0xff]  ;;  %v223_v20 = vld [vmem:[#allocation5 + $0x60] sm:$0xff]  ;;  %v224_v21 = vld [vmem:[#allocation5 + $0x68] sm:$0xff]  ;;  %p677_p4 = scmp.ne.s32.totalorder %s960_s9, %s676_s27  ;;  %s755_s22 = smov [#allocation7]  }
  0x5a   : > { %v528_v19 = vpack.c.bf16 %v222_v18, %v221_v17  ;;  %v531_v22 = vpack.c.bf16 %v224_v21, %v223_v20  ;;  %v225_v23 = vld [vmem:[#allocation5 + $0x70] sm:$0xff]  ;;  %v226_v24 = vld [vmem:[#allocation5 + $0x78] sm:$0xff]  ;;  %v208_v30 = vld [vmem:[%s929_s29 + $0x10] sm:$0xff]  ;;  %s680_s23 = sshll.u32 %s755_s22, 4  ;;  %s681_s23 = int_to_ptr.vmem [resolvable:$false] %s680_s23 }
  0x5b   : > { %v534_v25 = vpack.c.bf16 %v226_v24, %v225_v23  ;;  %v206_v26 = vld [vmem:[%s929_s29] sm:$0xff]  ;;  %v209_v27 = vld [vmem:[%s929_s29 + $0x18] sm:$0xff]  ;;  %v207_v28 = vld [vmem:[%s929_s29 + $0x8] sm:$0xff]  ;;  %p678_p6 = pnand %p677_p4, %p872_p12  ;;  %s682_s28 = scalar_lea.vmem %s681_s23, 1280 }
  0x5c   : > { %517 = vmatpush3.bf16.msra.mxu0 %v516_v7  ;;  %545 = vmatpush3.bf16.msra.mxu1 %v516_v7  ;;  %v210_v29 = vld [vmem:[%s929_s29 + $0x20] sm:$0xff]  ;;  %p683_p10 = scmp.lt.s32.totalorder %s960_s9, %s681_s23  ;;  %p684_p11 = scmp.lt.s32.totalorder %s682_s28, %s676_s27 }
  0x5d   : > { %518 = vmatprep.subr.bf16.mxu0 %v752_v0  ;;  %538 = vmatprep.subr.bf16.mxu1 %v752_v0  ;;  %v438_v31 = vld [vmem:[%s1011_s2] ss:$0 sm:$0xff]  ;;  %p679_p8 = pneg %p678_p6 }
  0x5e   : > { %p685_p3 = por %p684_p11, %p683_p10 }
  0x60   : > { %520 = vmatpush3.bf16.msra.mxu0 %v519_v10  ;;  %546 = vmatpush3.bf16.msra.mxu1 %v519_v10  ;;  %p686_p7 = pnand %p685_p3, %p679_p8 }
  0x61   : > { %521 = vmatprep.subr.bf16.mxu0 %v752_v0  ;;  %539 = vmatprep.subr.bf16.mxu1 %v752_v0 }
  0x64   : > { %523 = vmatpush3.bf16.msra.mxu0 %v522_v13  ;;  %547 = vmatpush3.bf16.msra.mxu1 %v522_v13 }
  0x65   : > { %524 = vmatprep.subr.bf16.mxu0 %v752_v0  ;;  %540 = vmatprep.subr.bf16.mxu1 %v752_v0 }
  0x68   : > { %526 = vmatpush3.bf16.msra.mxu0 %v525_v16  ;;  %548 = vmatpush3.bf16.msra.mxu1 %v525_v16 }
  0x69   : > { %527 = vmatprep.subr.bf16.mxu0 %v752_v0  ;;  %541 = vmatprep.subr.bf16.mxu1 %v752_v0 }
  0x6c   : > { %529 = vmatpush3.bf16.msra.mxu0 %v528_v19  ;;  %549 = vmatpush3.bf16.msra.mxu1 %v528_v19 }
  0x6d   : > { %530 = vmatprep.subr.bf16.mxu0 %v752_v0  ;;  %542 = vmatprep.subr.bf16.mxu1 %v752_v0 }
  0x70   : > { %532 = vmatpush3.bf16.msra.mxu0 %v531_v22  ;;  %550 = vmatpush3.bf16.msra.mxu1 %v531_v22 }
  0x71   : > { %533 = vmatprep.subr.bf16.mxu0 %v752_v0  ;;  %543 = vmatprep.subr.bf16.mxu1 %v752_v0 }
  0x74   : > { %535 = vmatpush3.bf16.msra.mxu0 %v534_v25  ;;  %551 = vmatpush3.bf16.msra.mxu1 %v534_v25 }
  0x77   : > { %498 = vmatmul.mubr.f32.vlgmr.msra.gmra.mrb[0].mxu0 %v206_v26  ;;  %507 = vmatmul.mubr.f32.vlgmr.msra.gmra.mrb[0].mxu1 %v209_v27 }
  0x78   : > { %500 = vmatprep.mubr.msk.f32.mxu0 %vm753_vm0, %v754_v1  ;;  %509 = vmatprep.mubr.msk.f32.mxu1 %vm753_vm0, %v754_v1 }
  0x7b   : > { %501 = vmatmul.mubr.f32.gmra.mrb[2].mxu0 %v207_v28  ;;  %510 = vmatmul.mubr.f32.gmra.mrb[2].mxu1 %v210_v29 }
  0x7c   : > { %503 = vmatprep.mubr.msk.f32.mxu0 %vm753_vm0, %v754_v1 }
  0x7f   : > { %504 = vmatmul.mubr.f32.gmra.mrb[4].mxu0 %v208_v30 }
 0x14a   : > { %v300_v32 = vpop.f32.mrb[0].mxu0  ;;  %v315_v33 = vpop.f32.mrb[0].mxu1 }
 0x14b   : > { %v301_v34 = vadd.f32 %v438_v31, %v300_v32  ;;  %v499_v35 = vpop.f32.mrb[1].mxu0  ;;  %v316_v36 = vadd.f32 %v438_v31, %v315_v33  ;;  %v508_v37 = vpop.f32.mrb[1].mxu1 }
 0x14d   : > { %v324_v38 = vmax.f32 %v301_v34, 0.0  ;;  %v327_v39 = vmax.f32 %v316_v36, 0.0 }
 0x14e   : > { %v305_v40 = vpop.f32.mrb[2].mxu0  ;;  %v320_v41 = vpop.f32.mrb[2].mxu1 }
 0x14f   : > { %329 = vst [vmem:[%s203_s8] sm:$0xff] %v324_v38  ;;  %332 = vst [vmem:[%s203_s8 + $0x18] sm:$0xff] %v327_v39  ;;  %v306_v42 = vadd.f32 %v438_v31, %v305_v40  ;;  %v502_v43 = vpop.f32.mrb[3].mxu0  ;;  %v321_v44 = vadd.f32 %v438_v31, %v320_v41  ;;  %v511_v45 = vpop.f32.mrb[3].mxu1 }
 0x151   : > { %v325_v46 = vmax.f32 %v306_v42, 0.0  ;;  %v328_v47 = vmax.f32 %v321_v44, 0.0 }
 0x152   : > { %v310_v48 = vpop.f32.mrb[4].mxu0 }
 0x153   : > { %330 = vst [vmem:[%s203_s8 + $0x8] sm:$0xff] %v325_v46  ;;  %333 = vst [vmem:[%s203_s8 + $0x20] sm:$0xff] %v328_v47  ;;  %v311_v49 = vadd.f32 %v438_v31, %v310_v48  ;;  %v505_v50 = vpop.f32.mrb[5].mxu0 }
 0x155   : > { %v326_v51 = vmax.f32 %v311_v49, 0.0 }
 0x157   : > { %331 = vst [vmem:[%s203_s8 + $0x10] sm:$0xff] %v326_v51 }
 0x158   : > { %689 = shalt.err (!%p686_p7)
}
 0x159   : > { %s690_s26 = scalar_lea.hbm %s965_s11, 640  ;;  %s694_s10 = scalar_lea.hbm %s1012_s3, 1280 }
 0x15a   : > { %p691_p9 = scmp.ne.s32.totalorder %s965_s11, %s690_s26  ;;  %p695_p5 = scmp.lt.u32.totalorder %s965_s11, %s1012_s3 }
 0x15b   : > { %p696_p13 = scmp.lt.u32.totalorder %s694_s10, %s690_s26  ;;  %p698_p4 = scmp.lt.u32.totalorder %s690_s26, %s965_s11 }
 0x15c   : > { %p692_p1 = pnand %p691_p9, %p872_p12 }
 0x15d   : > { %p697_p2 = por %p696_p13, %p695_p5 }
 0x15e   : > { %p693_p0 = pneg %p692_p1 }
 0x15f   : > { %p699_p6 = por %p698_p4, %p697_p2 }
 0x161   : > { %p700_p8 = pnand %p699_p6, %p693_p0 }
 0x163   : > { %703 = shalt.err (!%p700_p8)
}
 0x164   : > { %s756_s20 = smov 128   ;;  %s757_s8 = smov 8  }
 0x165   : > { %560 = dma.vmem_to_hbm [thread:$0]  (%p872_p12), %s960_s9, 640, %s965_s11, %s335_s16, %s756_s20, %s756_s20, %s757_s8  }
 0x166 PF: > { %s363_s25 = sand.u32 1, %s734_s12   ;;  %p1027_p10 = scmp.ne.s32.totalorder %s1017_s19, 0 }
 0x167   : > { %p1028_p11 = scmp.ge.s32.totalorder %s746_s15, 2  ;;  %s364_s4 = scalar_lea.sflag [#allocation4], %s363_s25 }
 0x169   : > { %p571_p3 = pnand %p1028_p11, %p1027_p10 }
 0x16b   : > { %729 = dma.done.wait (!%p571_p3), %s364_s4, 640  }
 0x16c   : > { %731 = vsyncadd (!%p571_p3), %s364_s4, 4294966656  ;;  %p17_p7 = scmp.ge.s32.totalorder %s834_s24, 4   ;;  %s1029_s12 = smov %s738_s13 }
 0x16d   : > { %s1030_s13 = smov %s742_s14  ;;  %s1031_s14 = smov %s868_s17 }
 0x16e   : > { %s1032_s15 = smov %s834_s24  ;;  %19 = sbr.rel (!%p17_p7) target bundleno = 6 (0x6), region = 81 }
 0x175   :  { %369 = vsyncpa [#allocation3], 1 }
 0x176   :  { %371 = vsyncpa [#allocation3 + $0x1], 1 }
 0x177   :  { %372 = vsyncpa [#allocation6], 1 }
 0x178   :  { %373 = vsyncpa [#allocation4], 1 }
 0x179   :  { %375 = vsyncpa [#allocation4 + $0x1], 1 }

</bundles_post_ra>
